<compile_context>
chip_gen: v6e
topology: v6e:2x2x1
jax: 0.10.0
libtpu: 0.0.40
codegen_flags: <defaults>
</compile_context>

<pallas_src>
import functools

import jax
import jax.numpy as jnp
from jax.experimental import pallas as pl
from jax.experimental.pallas import tpu as pltpu


_VMEM_LIMIT_BYTES = 64 * 1024 * 1024   # explicit scoped-VMEM cap (<= v7x physical 64 MiB)
_VMEM_BLOCK_BUDGET = 26 * 1024 * 1024  # what blocks + in-kernel intermediates may use
_TARGET_MXU_ROWS = 1024                # M-dim target for the dominant matmul
_FUSED_MAX_HW = 1024                   # kron-fused path for images up to 32x32


def _round_up(x, m):
    return (x + m - 1) // m * m


def _dft_matrix_parts(n):
    """Real/imag parts of the N-point DFT matrix F[k, m] = exp(-2i*pi*k*m/N).

    k*m is reduced mod N in int32 *before* the float cast so the angle keeps
    full precision. Exact for N < 46341 (int32 product), far beyond any
    realistic image DFT size.
    """
    k = jnp.arange(n, dtype=jnp.int32)
    km = (k[:, None] * k[None, :]) % jnp.int32(n)
    ang = (-2.0 * jnp.pi / float(n)) * km.astype(jnp.float32)
    return jnp.cos(ang), jnp.sin(ang)


def _pick_tb(bc, bytes_per_img, fixed_bytes, rows_per_img, align):
    """Images per grid step.

    Fits the VMEM block budget (lane-padding-aware footprint), fills the MXU
    M dimension (~_TARGET_MXU_ROWS rows), is a multiple of `align` (8 when the
    output block is 2-D so the sublane rule holds), and leaves >= 2 grid
    blocks when the batch allows it so both v7x TensorCores get work.
    """
    budget = _VMEM_BLOCK_BUDGET - fixed_bytes
    tb = max(1, budget // max(bytes_per_img, 1))
    tb = min(tb, max(1, _TARGET_MXU_ROWS // max(rows_per_img, 1)))
    tb = max(1, min(tb, bc))
    tb = _round_up(tb, align)
    if bc >= 2 * align:
        tb = min(tb, _round_up(pl.cdiv(bc, 2), align))
    return tb


def _fft2_fused_kernel(x_ref, f2d_ref, y_ref):
    """Whole 2-D DFT of tb flattened images as ONE lane-dense MXU matmul.

    x_ref  : (tb, H*W)      real input, row-major (H outer, W inner)
    f2d_ref: (H*W, 2*H*W)   [Re(kron(Fh,Fw)) | Im(kron(Fh,Fw))]
    y_ref  : (tb, 2*H*W)    [Y_r flat | Y_i flat]
    """
    y_ref[...] = jnp.dot(
        x_ref[...], f2d_ref[...], preferred_element_type=jnp.float32
    ).astype(y_ref.dtype)


def _fft2_twostage_kernel(x_ref, fw_ref, fh_ref, y_ref):
    """Row/column 2-D DFT of a block of tb real images (larger H*W).

    x_ref : (tb, H, W)
    fw_ref: (W, 2W)   [Fw_r | Fw_i]
    fh_ref: (H, 2H)   [Fh_r | Fh_i]
    y_ref : (tb, 2H, W) = [Y_r ; Y_i]   or   (tb, 2*H*W) flat [Y_r | Y_i]
    """
    tb, h, w = x_ref.shape

    # stage 1: DFT along W as one flat MXU matmul.
    x = x_ref[...].reshape(tb * h, w)
    a = jnp.dot(x, fw_ref[...], preferred_element_type=jnp.float32)      # (tb*h, 2w)
    a = a.reshape(tb, h, 2 * w)

    # per-image transpose so H becomes the contraction axis of stage 2.
    at = jnp.swapaxes(a, 1, 2).reshape(tb * 2 * w, h).astype(fh_ref.dtype)

    # stage 2: DFT along H as one flat MXU matmul.
    z = jnp.dot(at, fh_ref[...], preferred_element_type=jnp.float32)     # (tb*2w, 2h)
    z = z.reshape(tb, 2 * w, 2 * h)

    # Complex recombination (DFT matrices are symmetric: A^T F == (F A)^T):
    #   z[:, :w, :h]=(Fh_r A_r)^T   z[:, :w, h:]=(Fh_i A_r)^T
    #   z[:, w:, :h]=(Fh_r A_i)^T   z[:, w:, h:]=(Fh_i A_i)^T
    yr = jnp.swapaxes(z[:, :w, :h] - z[:, w:, h:], 1, 2)                 # (tb, h, w) = Y_r
    yi = jnp.swapaxes(z[:, :w, h:] + z[:, w:, :h], 1, 2)                 # (tb, h, w) = Y_i

    if y_ref.ndim == 2:
        # Flat lane-dense output (used when W is not a lane multiple).
        y_ref[:, : h * w] = yr.reshape(tb, h * w)
        y_ref[:, h * w:] = yi.reshape(tb, h * w)
    else:
        # W already lane-dense: store the two halves directly (no concat).
        y_ref[:, :h, :] = yr
        y_ref[:, h:, :] = yi


@functools.partial(jax.jit, static_argnames=("compute_dtype",))
def fourier_transform_layer(x, *, compute_dtype=jnp.float32):
    """Pallas equivalent of torch.fft.fft2(x) for real NCHW input -> complex64."""
    B, C, H, W = x.shape
    bc = B * C
    hw = H * W
    isz = jnp.dtype(compute_dtype).itemsize

    fwr, fwi = _dft_matrix_parts(W)
    fhr, fhi = _dft_matrix_parts(H)

    if hw <= _FUSED_MAX_HW:
        # ---------------- fused small-image path --------------------------
        # kron(Fh, Fw)[h*W+w, u*W+v] = Fh[u,h] * Fw[v,w]  (F symmetric), so
        # Y_flat = X_flat @ kron(Fh, Fw); split into real | imag columns.
        f2d_r = jnp.kron(fhr, fwr) - jnp.kron(fhi, fwi)
        f2d_i = jnp.kron(fhr, fwi) + jnp.kron(fhi, fwr)
        f2d = jnp.concatenate([f2d_r, f2d_i], axis=1).astype(compute_dtype)  # (HW, 2HW)
        xf = x.reshape(bc, hw).astype(compute_dtype)

        in_cols = _round_up(hw, 128)
        out_cols = _round_up(2 * hw, 128)
        # double-buffered input + output blocks, plus the matmul result.
        bytes_per_img = 2 * in_cols * isz + 2 * out_cols * 4 + out_cols * 4
        fixed_bytes = 2 * hw * out_cols * isz   # F2D, default double-buffered
        # TODO(synk): F2D is grid-invariant; pipeline_mode=pl.Buffered(1) would
        # halve its footprint, left out for compatibility (small at HW<=1024).

        tb = _pick_tb(bc, bytes_per_img, fixed_bytes, rows_per_img=1, align=8)
        num_blocks = pl.cdiv(bc, tb)
        bc_pad = num_blocks * tb
        if bc_pad != bc:
            xf = jnp.pad(xf, ((0, bc_pad - bc), (0, 0)))

        flops = 2 * bc_pad * hw * (2 * hw)
        bytes_accessed = bc_pad * hw * isz + bc_pad * 2 * hw * 4 + hw * 2 * hw * isz

        out = pl.pallas_call(
            _fft2_fused_kernel,
            out_shape=jax.ShapeDtypeStruct((bc_pad, 2 * hw), jnp.float32),
            grid_spec=pltpu.PrefetchScalarGridSpec(
                num_scalar_prefetch=0,
                grid=(num_blocks,),
                in_specs=[
                    pl.BlockSpec((tb, hw), lambda i: (i, 0)),          # image block
                    pl.BlockSpec((hw, 2 * hw), lambda i: (0, 0)),      # F2D (shared)
                ],
                out_specs=pl.BlockSpec((tb, 2 * hw), lambda i: (i, 0)),
            ),
            compiler_params=pltpu.CompilerParams(
                dimension_semantics=("parallel",),
                vmem_limit_bytes=_VMEM_LIMIT_BYTES,
            ),
            cost_estimate=pl.CostEstimate(
                flops=flops, transcendentals=0, bytes_accessed=bytes_accessed),
        )(xf, f2d)
    else:
        # ---------------- two-stage path (larger images) -------------------
        fw_cat = jnp.concatenate([fwr, fwi], axis=1).astype(compute_dtype)   # (W, 2W)
        fh_cat = jnp.concatenate([fhr, fhi], axis=1).astype(compute_dtype)   # (H, 2H)
        xf = x.reshape(bc, H, W).astype(compute_dtype)

        wp = _round_up(W, 128)
        hp = _round_up(H, 128)
        w2p = _round_up(2 * W, 128)
        h2p = _round_up(2 * H, 128)
        bytes_per_img = (
            2 * H * wp * isz        # input block (double-buffered)
            + 2 * 2 * H * wp * 4    # output block (double-buffered)
            + H * w2p * 4           # stage-1 result a
            + 2 * W * hp * 4        # transposed a
            + 2 * W * h2p * 4       # stage-2 result z
            + 2 * W * hp * 4        # yr_t / yi_t
            + 2 * H * wp * 4        # transposed yr / yi
        )
        fixed_bytes = 2 * (W * w2p + H * h2p) * isz   # DFT matrices, double-buffered
        # TODO(synk): fw_cat/fh_cat are grid-invariant; pl.Buffered(1) would halve
        # fixed_bytes, left out for compatibility.

        # Flat lane-dense output when W is not a lane multiple (needs tb % 8 == 0).
        flat_out = (W % 128 != 0) and (fixed_bytes + 8 * bytes_per_img
                                       <= _VMEM_BLOCK_BUDGET)
        align = 8 if flat_out else 1
        tb = _pick_tb(bc, bytes_per_img, fixed_bytes, rows_per_img=H, align=align)
        num_blocks = pl.cdiv(bc, tb)
        bc_pad = num_blocks * tb
        if bc_pad != bc:
            xf = jnp.pad(xf, ((0, bc_pad - bc), (0, 0), (0, 0)))

        if flat_out:
            out_shape = jax.ShapeDtypeStruct((bc_pad, 2 * hw), jnp.float32)
            out_spec = pl.BlockSpec((tb, 2 * hw), lambda i: (i, 0))
        else:
            out_shape = jax.ShapeDtypeStruct((bc_pad, 2 * H, W), jnp.float32)
            out_spec = pl.BlockSpec((tb, 2 * H, W), lambda i: (i, 0, 0))

        flops = 2 * (bc_pad * H) * W * (2 * W) + 2 * (bc_pad * 2 * W) * H * (2 * H)
        bytes_accessed = (bc_pad * hw * isz + bc_pad * 2 * hw * 4
                          + (W * 2 * W + H * 2 * H) * isz)

        out = pl.pallas_call(
            _fft2_twostage_kernel,
            out_shape=out_shape,
            grid_spec=pltpu.PrefetchScalarGridSpec(
                num_scalar_prefetch=0,
                grid=(num_blocks,),
                in_specs=[
                    pl.BlockSpec((tb, H, W), lambda i: (i, 0, 0)),     # image block
                    pl.BlockSpec((W, 2 * W), lambda i: (0, 0)),        # [Fw_r | Fw_i]
                    pl.BlockSpec((H, 2 * H), lambda i: (0, 0)),        # [Fh_r | Fh_i]
                ],
                out_specs=out_spec,
            ),
            compiler_params=pltpu.CompilerParams(
                dimension_semantics=("parallel",),
                vmem_limit_bytes=_VMEM_LIMIT_BYTES,
            ),
            cost_estimate=pl.CostEstimate(
                flops=flops, transcendentals=0, bytes_accessed=bytes_accessed),
        )(xf, fw_cat, fh_cat)

    # Both paths store [Y_r | Y_i] contiguously per image.
    out = out[:bc].reshape(bc, 2, H, W)
    # TODO(synk): Pallas has no complex dtype; the final complex pack stays in XLA.
    y = jax.lax.complex(out[:, 0], out[:, 1])
    return y.reshape(B, C, H, W)


if __name__ == "__main__":
    key = jax.random.PRNGKey(0)
    B, C, H, W = 2, 4, 16, 16
    x = jax.random.normal(key, (B, C, H, W), dtype=jnp.float32)

    y = fourier_transform_layer(x)
    y = jax.block_until_ready(y)

    # sanity check against JAX's reference fft2
    y_ref = jnp.fft.fft2(x)
    assert y.shape == y_ref.shape and y.dtype == jnp.complex64
    assert jnp.allclose(y, y_ref, atol=1e-3, rtol=1e-3)

    print("KERNEL_OK")
</pallas_src>

<mosaic_0001>
module attributes {stable_mosaic.version = 11 : i64} {
  func.func @_fft2_fused_kernel(%arg0: i32, %arg1: memref<8x256xf32, #tpu.memory_space<vmem>>, %arg2: memref<256x512xf32, #tpu.memory_space<vmem>>, %arg3: memref<8x512xf32, #tpu.memory_space<vmem>>) attributes {dimension_semantics = [#tpu.dimension_semantics<parallel>], iteration_bounds = array<i64: 1>, scalar_prefetch = 0 : i64, scratch_operands = 0 : i64, tpu.core_type = #tpu.core_type<tc>, window_params = [{transform_indices = @transform_0, window_bounds = array<i64: 8, 256>}, {pipeline_mode = #tpu.pipeline_mode<synchronous>, transform_indices = @transform_1, window_bounds = array<i64: 256, 512>}, {transform_indices = @transform_2, window_bounds = array<i64: 8, 512>}]} {
    %c0 = arith.constant 0 : index
    %c0_0 = arith.constant 0 : index
    %0 = vector.load %arg1[%c0, %c0_0] : memref<8x256xf32, #tpu.memory_space<vmem>>, vector<8x256xf32>
    %c0_1 = arith.constant 0 : index
    %c0_2 = arith.constant 0 : index
    %1 = vector.load %arg2[%c0_1, %c0_2] : memref<256x512xf32, #tpu.memory_space<vmem>>, vector<256x512xf32>
    %cst = arith.constant dense<0.000000e+00> : vector<8x512xf32>
    %2 = tpu.matmul %0, %1, %cst {dimension_numbers = #tpu.dot_dimension_numbers<[1], [0], [0], [1], [0, 0, 1, 1], [], []>} : vector<8x256xf32>, vector<256x512xf32>, vector<8x512xf32> -> vector<8x512xf32>
    %c0_3 = arith.constant 0 : index
    %c0_4 = arith.constant 0 : index
    %3 = vector.load %arg3[%c0_3, %c0_4] : memref<8x512xf32, #tpu.memory_space<vmem>>, vector<8x512xf32>
    tpu.vector_store %arg3[%c0_3, %c0_4], %2 {strides = array<i32>} : memref<8x512xf32, #tpu.memory_space<vmem>>, vector<8x512xf32>,
    return
  }
  func.func @transform_0(%arg0: i32) -> (i32, i32) {
    %c0_i32 = arith.constant 0 : i32
    %c0_i32_0 = arith.constant 0 : i32
    return %arg0, %c0_i32 : i32, i32
  }
  func.func @transform_1(%arg0: i32) -> (i32, i32) {
    %c0_i32 = arith.constant 0 : i32
    %c0_i32_0 = arith.constant 0 : i32
    %c0_i32_1 = arith.constant 0 : i32
    return %c0_i32, %c0_i32_0 : i32, i32
  }
  func.func @transform_2(%arg0: i32) -> (i32, i32) {
    %c0_i32 = arith.constant 0 : i32
    %c0_i32_0 = arith.constant 0 : i32
    return %arg0, %c0_i32 : i32, i32
  }
}

</mosaic_0001>

<bundles_post_ra>
// kernel: custom-call
= control target key start
LH: loop header
LB: loop body
LE: loop exit
PB: predicated region body
PF: predicated region fallthrough
CT: control target
= control target key end

     0   :  { %s92_s0 = inlined_call_operand.vmem [shape: f32[2,4,16,16], index: 0, kind: input, shape index: {}]   ;;  %s93_s1 = inlined_call_operand.vmem [shape: f32[2,4,16,16], index: 1, kind: input, shape index: {}]   ;;  %s94_s2 = inlined_call_operand.hbm [shape: c64[2,4,16,16], index: 2, kind: output, shape index: {}]  }
   0x1   :  { %s3_s11 = scalar_lea.hbm %s94_s2, 2048 }
   0x2   :  { %4 = vsyncpa [#allocation0], 0  ;;  %s5_s14 = sshll.u32 %s92_s0, 4  ;;  %s6_s14 = int_to_ptr.vmem [resolvable:$true] %s5_s14 }
   0x3   :  { %s18_s15 = scalar_lea.vmem %s6_s14, 2048  ;;  %p23_p1 = scmp.lt.s32.totalorder %s6_s14, %s6_s14 }
   0x4   :  { %p19_p0 = scmp.ne.s32.totalorder %s6_s14, %s18_s15  ;;  %p24_p2 = scmp.lt.s32.totalorder %s18_s15, %s18_s15 }
   0x6   :  { %p25_p3 = por %p24_p2, %p23_p1 }
   0x8   :  { %p26_p4 = pnand %p25_p3, %p19_p0 }
   0xa   :  { %29 = shalt.err (!%p26_p4)  }
   0xb   :  { %8 = dma.vmem_to_hbm [thread:$0]  %s6_s14, 2048, %s94_s2, [#allocation0] }
   0xc   :  { %61 = dma.done.wait [#allocation0], 2048  }
   0xd   :  { %62 = vsyncadd [#allocation0], 4294965248 }
   0xe   :  { %10 = vsyncpa [#allocation0], 1 }
   0xf   :  { %11 = vsyncpa [#allocation1], 0  ;;  %s12_s0 = sshll.u32 %s93_s1, 4  ;;  %s13_s0 = int_to_ptr.vmem [resolvable:$true] %s12_s0 }
  0x10   :  { %s38_s20 = scalar_lea.vmem %s13_s0, 2048  ;;  %p43_p6 = scmp.lt.s32.totalorder %s13_s0, %s13_s0 }
  0x11   :  { %p39_p5 = scmp.ne.s32.totalorder %s13_s0, %s38_s20  ;;  %p44_p7 = scmp.lt.s32.totalorder %s38_s20, %s38_s20 }
  0x13   :  { %p45_p8 = por %p44_p7, %p43_p6 }
  0x15   :  { %p46_p9 = pnand %p45_p8, %p39_p5 }
  0x17   :  { %49 = shalt.err (!%p46_p9)  }
  0x18   :  { %15 = dma.vmem_to_hbm [thread:$0]  %s13_s0, 2048, %s3_s11, [#allocation1] }
  0x19   :  { %63 = dma.done.wait [#allocation1], 2048  }
  0x1a   :  { %64 = vsyncadd [#allocation1], 4294965248 }
  0x1b   :  { %17 = vsyncpa [#allocation1], 1 }

// kernel: fourier_transform_layer.1
= control target key start
LH: loop header
LB: loop body
LE: loop exit
PB: predicated region body
PF: predicated region fallthrough
CT: control target
= control target key end

     0   :  { %s708_s1 = inlined_call_operand.vmem [shape: f32[256,512], index: 1, kind: input, shape index: {}]   ;;  %s709_s0 = inlined_call_operand.vmem [shape: f32[8,256], index: 0, kind: input, shape index: {}]   ;;  %s710_s2 = inlined_call_operand.vmem [shape: f32[8,512], index: 2, kind: output, shape index: {}]  }
   0x1   :  { %v74_v0 = vld [vmem:[%s708_s1 + $0x1e8] sm:$0xff]  ;;  %v76_v1 = vld [vmem:[%s708_s1 + $0x1f8] sm:$0xff]  ;;  %v73_v2 = vld [vmem:[%s708_s1 + $0x1e0] sm:$0xff] }
   0x2   :  { %141 = vmatprep.subr.mxu0 %v74_v0  ;;  %212 = vmatprep.subr.mxu1 %v76_v1  ;;  %v75_v3 = vld [vmem:[%s708_s1 + $0x1f0] sm:$0xff]  ;;  %v70_v4 = vld [vmem:[%s708_s1 + $0x1c8] sm:$0xff]  ;;  %v72_v5 = vld [vmem:[%s708_s1 + $0x1d8] sm:$0xff] }
   0x3   :  { %142 = vmatpush1.msra.mxu0 %v73_v2  ;;  %213 = vmatpush1.msra.mxu1 %v75_v3  ;;  %v69_v6 = vld [vmem:[%s708_s1 + $0x1c0] sm:$0xff]  ;;  %v71_v7 = vld [vmem:[%s708_s1 + $0x1d0] sm:$0xff]  ;;  %v66_v8 = vld [vmem:[%s708_s1 + $0x1a8] sm:$0xff] }
   0x4   :  { %143 = vmatprep.subr.mxu0 %v70_v4  ;;  %214 = vmatprep.subr.mxu1 %v72_v5  ;;  %v68_v9 = vld [vmem:[%s708_s1 + $0x1b8] sm:$0xff]  ;;  %v65_v10 = vld [vmem:[%s708_s1 + $0x1a0] sm:$0xff]  ;;  %v67_v11 = vld [vmem:[%s708_s1 + $0x1b0] sm:$0xff] }
   0x5   :  { %144 = vmatpush1.msra.mxu0 %v69_v6  ;;  %215 = vmatpush1.msra.mxu1 %v71_v7  ;;  %v62_v12 = vld [vmem:[%s708_s1 + $0x188] sm:$0xff]  ;;  %v64_v13 = vld [vmem:[%s708_s1 + $0x198] sm:$0xff]  ;;  %v61_v14 = vld [vmem:[%s708_s1 + $0x180] sm:$0xff] }
   0x6   :  { %145 = vmatprep.subr.mxu0 %v66_v8  ;;  %216 = vmatprep.subr.mxu1 %v68_v9  ;;  %v63_v15 = vld [vmem:[%s708_s1 + $0x190] sm:$0xff]  ;;  %v58_v16 = vld [vmem:[%s708_s1 + $0x168] sm:$0xff]  ;;  %v60_v17 = vld [vmem:[%s708_s1 + $0x178] sm:$0xff] }
   0x7   :  { %146 = vmatpush1.msra.mxu0 %v65_v10  ;;  %217 = vmatpush1.msra.mxu1 %v67_v11  ;;  %v57_v18 = vld [vmem:[%s708_s1 + $0x160] sm:$0xff]  ;;  %v59_v19 = vld [vmem:[%s708_s1 + $0x170] sm:$0xff]  ;;  %v54_v20 = vld [vmem:[%s708_s1 + $0x148] sm:$0xff] }
   0x8   :  { %147 = vmatprep.subr.mxu0 %v62_v12  ;;  %218 = vmatprep.subr.mxu1 %v64_v13  ;;  %v56_v21 = vld [vmem:[%s708_s1 + $0x158] sm:$0xff]  ;;  %v53_v22 = vld [vmem:[%s708_s1 + $0x140] sm:$0xff]  ;;  %v55_v23 = vld [vmem:[%s708_s1 + $0x150] sm:$0xff] }
   0x9   :  { %148 = vmatpush1.msra.mxu0 %v61_v14  ;;  %219 = vmatpush1.msra.mxu1 %v63_v15  ;;  %v50_v24 = vld [vmem:[%s708_s1 + $0x128] sm:$0xff]  ;;  %v52_v25 = vld [vmem:[%s708_s1 + $0x138] sm:$0xff]  ;;  %v49_v26 = vld [vmem:[%s708_s1 + $0x120] sm:$0xff] }
   0xa   :  { %149 = vmatprep.subr.mxu0 %v58_v16  ;;  %220 = vmatprep.subr.mxu1 %v60_v17  ;;  %v51_v27 = vld [vmem:[%s708_s1 + $0x130] sm:$0xff]  ;;  %v46_v28 = vld [vmem:[%s708_s1 + $0x108] sm:$0xff]  ;;  %v48_v29 = vld [vmem:[%s708_s1 + $0x118] sm:$0xff] }
   0xb   :  { %150 = vmatpush1.msra.mxu0 %v57_v18  ;;  %221 = vmatpush1.msra.mxu1 %v59_v19  ;;  %v45_v30 = vld [vmem:[%s708_s1 + $0x100] sm:$0xff]  ;;  %v47_v31 = vld [vmem:[%s708_s1 + $0x110] sm:$0xff]  ;;  %v42_v32 = vld [vmem:[%s708_s1 + $0xe8] sm:$0xff] }
   0xc   :  { %151 = vmatprep.subr.mxu0 %v54_v20  ;;  %222 = vmatprep.subr.mxu1 %v56_v21  ;;  %v44_v33 = vld [vmem:[%s708_s1 + $0xf8] sm:$0xff]  ;;  %v41_v34 = vld [vmem:[%s708_s1 + $0xe0] sm:$0xff]  ;;  %v43_v35 = vld [vmem:[%s708_s1 + $0xf0] sm:$0xff] }
   0xd   :  { %152 = vmatpush1.msra.mxu0 %v53_v22  ;;  %223 = vmatpush1.msra.mxu1 %v55_v23  ;;  %v38_v36 = vld [vmem:[%s708_s1 + $0xc8] sm:$0xff]  ;;  %v40_v37 = vld [vmem:[%s708_s1 + $0xd8] sm:$0xff]  ;;  %v37_v38 = vld [vmem:[%s708_s1 + $0xc0] sm:$0xff] }
   0xe   :  { %153 = vmatprep.subr.mxu0 %v50_v24  ;;  %224 = vmatprep.subr.mxu1 %v52_v25  ;;  %v39_v39 = vld [vmem:[%s708_s1 + $0xd0] sm:$0xff]  ;;  %v34_v40 = vld [vmem:[%s708_s1 + $0xa8] sm:$0xff]  ;;  %v36_v41 = vld [vmem:[%s708_s1 + $0xb8] sm:$0xff] }
   0xf   :  { %154 = vmatpush1.msra.mxu0 %v49_v26  ;;  %225 = vmatpush1.msra.mxu1 %v51_v27  ;;  %v33_v42 = vld [vmem:[%s708_s1 + $0xa0] sm:$0xff]  ;;  %v35_v43 = vld [vmem:[%s708_s1 + $0xb0] sm:$0xff]  ;;  %v30_v44 = vld [vmem:[%s708_s1 + $0x88] sm:$0xff] }
  0x10   :  { %155 = vmatprep.subr.mxu0 %v46_v28  ;;  %226 = vmatprep.subr.mxu1 %v48_v29  ;;  %v32_v45 = vld [vmem:[%s708_s1 + $0x98] sm:$0xff]  ;;  %v29_v46 = vld [vmem:[%s708_s1 + $0x80] sm:$0xff]  ;;  %v31_v47 = vld [vmem:[%s708_s1 + $0x90] sm:$0xff] }
  0x11   :  { %156 = vmatpush1.msra.mxu0 %v45_v30  ;;  %227 = vmatpush1.msra.mxu1 %v47_v31  ;;  %v26_v48 = vld [vmem:[%s708_s1 + $0x68] sm:$0xff]  ;;  %v28_v49 = vld [vmem:[%s708_s1 + $0x78] sm:$0xff]  ;;  %v25_v50 = vld [vmem:[%s708_s1 + $0x60] sm:$0xff] }
  0x12   :  { %157 = vmatprep.subr.mxu0 %v42_v32  ;;  %228 = vmatprep.subr.mxu1 %v44_v33  ;;  %v27_v51 = vld [vmem:[%s708_s1 + $0x70] sm:$0xff]  ;;  %v22_v52 = vld [vmem:[%s708_s1 + $0x48] sm:$0xff]  ;;  %v24_v53 = vld [vmem:[%s708_s1 + $0x58] sm:$0xff] }
  0x13   :  { %158 = vmatpush1.msra.mxu0 %v41_v34  ;;  %229 = vmatpush1.msra.mxu1 %v43_v35  ;;  %v21_v54 = vld [vmem:[%s708_s1 + $0x40] sm:$0xff]  ;;  %v23_v55 = vld [vmem:[%s708_s1 + $0x50] sm:$0xff]  ;;  %v18_v56 = vld [vmem:[%s708_s1 + $0x28] sm:$0xff] }
  0x14   :  { %159 = vmatprep.subr.mxu0 %v38_v36  ;;  %230 = vmatprep.subr.mxu1 %v40_v37  ;;  %v20_v57 = vld [vmem:[%s708_s1 + $0x38] sm:$0xff]  ;;  %v17_v58 = vld [vmem:[%s708_s1 + $0x20] sm:$0xff]  ;;  %v19_v59 = vld [vmem:[%s708_s1 + $0x30] sm:$0xff] }
  0x15   :  { %160 = vmatpush1.msra.mxu0 %v37_v38  ;;  %231 = vmatpush1.msra.mxu1 %v39_v39  ;;  %v14_v60 = vld [vmem:[%s708_s1 + $0x8] sm:$0xff]  ;;  %v16_v61 = vld [vmem:[%s708_s1 + $0x18] sm:$0xff]  ;;  %v13_v62 = vld [vmem:[%s708_s1] sm:$0xff] }
  0x16   :  { %161 = vmatprep.subr.mxu0 %v34_v40  ;;  %232 = vmatprep.subr.mxu1 %v36_v41  ;;  %v15_v63 = vld [vmem:[%s708_s1 + $0x10] sm:$0xff]  ;;  %v138_v0 = vld [vmem:[%s708_s1 + $0x3e8] sm:$0xff]  ;;  %v140_v1 = vld [vmem:[%s708_s1 + $0x3f8] sm:$0xff] }
  0x17   :  { %162 = vmatpush1.msra.mxu0 %v33_v42  ;;  %233 = vmatpush1.msra.mxu1 %v35_v43  ;;  %v137_v2 = vld [vmem:[%s708_s1 + $0x3e0] sm:$0xff]  ;;  %v139_v3 = vld [vmem:[%s708_s1 + $0x3f0] sm:$0xff]  ;;  %v134_v4 = vld [vmem:[%s708_s1 + $0x3c8] sm:$0xff] }
  0x18   :  { %163 = vmatprep.subr.mxu0 %v30_v44  ;;  %234 = vmatprep.subr.mxu1 %v32_v45  ;;  %v136_v5 = vld [vmem:[%s708_s1 + $0x3d8] sm:$0xff]  ;;  %v133_v6 = vld [vmem:[%s708_s1 + $0x3c0] sm:$0xff]  ;;  %v135_v7 = vld [vmem:[%s708_s1 + $0x3d0] sm:$0xff] }
  0x19   :  { %164 = vmatpush1.msra.mxu0 %v29_v46  ;;  %235 = vmatpush1.msra.mxu1 %v31_v47  ;;  %v130_v8 = vld [vmem:[%s708_s1 + $0x3a8] sm:$0xff]  ;;  %v132_v9 = vld [vmem:[%s708_s1 + $0x3b8] sm:$0xff]  ;;  %v129_v10 = vld [vmem:[%s708_s1 + $0x3a0] sm:$0xff] }
  0x1a   :  { %165 = vmatprep.subr.mxu0 %v26_v48  ;;  %236 = vmatprep.subr.mxu1 %v28_v49  ;;  %v131_v11 = vld [vmem:[%s708_s1 + $0x3b0] sm:$0xff]  ;;  %v126_v12 = vld [vmem:[%s708_s1 + $0x388] sm:$0xff]  ;;  %v128_v13 = vld [vmem:[%s708_s1 + $0x398] sm:$0xff] }
  0x1b   :  { %166 = vmatpush1.msra.mxu0 %v25_v50  ;;  %237 = vmatpush1.msra.mxu1 %v27_v51  ;;  %v125_v14 = vld [vmem:[%s708_s1 + $0x380] sm:$0xff]  ;;  %v127_v15 = vld [vmem:[%s708_s1 + $0x390] sm:$0xff]  ;;  %v122_v16 = vld [vmem:[%s708_s1 + $0x368] sm:$0xff] }
  0x1c   :  { %167 = vmatprep.subr.mxu0 %v22_v52  ;;  %238 = vmatprep.subr.mxu1 %v24_v53  ;;  %v124_v17 = vld [vmem:[%s708_s1 + $0x378] sm:$0xff]  ;;  %v121_v18 = vld [vmem:[%s708_s1 + $0x360] sm:$0xff]  ;;  %v123_v19 = vld [vmem:[%s708_s1 + $0x370] sm:$0xff] }
  0x1d   :  { %168 = vmatpush1.msra.mxu0 %v21_v54  ;;  %239 = vmatpush1.msra.mxu1 %v23_v55  ;;  %v118_v20 = vld [vmem:[%s708_s1 + $0x348] sm:$0xff]  ;;  %v120_v21 = vld [vmem:[%s708_s1 + $0x358] sm:$0xff]  ;;  %v117_v22 = vld [vmem:[%s708_s1 + $0x340] sm:$0xff] }
  0x1e   :  { %169 = vmatprep.subr.mxu0 %v18_v56  ;;  %240 = vmatprep.subr.mxu1 %v20_v57  ;;  %v119_v23 = vld [vmem:[%s708_s1 + $0x350] sm:$0xff]  ;;  %v114_v24 = vld [vmem:[%s708_s1 + $0x328] sm:$0xff]  ;;  %v116_v25 = vld [vmem:[%s708_s1 + $0x338] sm:$0xff] }
  0x1f   :  { %170 = vmatpush1.msra.mxu0 %v17_v58  ;;  %241 = vmatpush1.msra.mxu1 %v19_v59  ;;  %v113_v26 = vld [vmem:[%s708_s1 + $0x320] sm:$0xff]  ;;  %v115_v27 = vld [vmem:[%s708_s1 + $0x330] sm:$0xff]  ;;  %v110_v28 = vld [vmem:[%s708_s1 + $0x308] sm:$0xff] }
  0x20   :  { %171 = vmatprep.subr.mxu0 %v14_v60  ;;  %242 = vmatprep.subr.mxu1 %v16_v61  ;;  %v112_v29 = vld [vmem:[%s708_s1 + $0x318] sm:$0xff]  ;;  %v109_v30 = vld [vmem:[%s708_s1 + $0x300] sm:$0xff]  ;;  %v111_v31 = vld [vmem:[%s708_s1 + $0x310] sm:$0xff] }
  0x21   :  { %172 = vmatpush1.msra.mxu0 %v13_v62  ;;  %243 = vmatpush1.msra.mxu1 %v15_v63  ;;  %v106_v32 = vld [vmem:[%s708_s1 + $0x2e8] sm:$0xff]  ;;  %v108_v33 = vld [vmem:[%s708_s1 + $0x2f8] sm:$0xff]  ;;  %v105_v34 = vld [vmem:[%s708_s1 + $0x2e0] sm:$0xff] }
  0x22   :  { %173 = vmatprep.subr.mxu0 %v138_v0  ;;  %244 = vmatprep.subr.mxu1 %v140_v1  ;;  %v107_v35 = vld [vmem:[%s708_s1 + $0x2f0] sm:$0xff]  ;;  %v102_v36 = vld [vmem:[%s708_s1 + $0x2c8] sm:$0xff]  ;;  %v104_v37 = vld [vmem:[%s708_s1 + $0x2d8] sm:$0xff] }
  0x23   :  { %174 = vmatpush2.msra.mxu0 %v137_v2  ;;  %245 = vmatpush2.msra.mxu1 %v139_v3  ;;  %v101_v38 = vld [vmem:[%s708_s1 + $0x2c0] sm:$0xff]  ;;  %v103_v39 = vld [vmem:[%s708_s1 + $0x2d0] sm:$0xff]  ;;  %v98_v40 = vld [vmem:[%s708_s1 + $0x2a8] sm:$0xff] }
  0x24   :  { %175 = vmatprep.subr.mxu0 %v134_v4  ;;  %246 = vmatprep.subr.mxu1 %v136_v5  ;;  %v100_v41 = vld [vmem:[%s708_s1 + $0x2b8] sm:$0xff]  ;;  %v97_v42 = vld [vmem:[%s708_s1 + $0x2a0] sm:$0xff]  ;;  %v99_v43 = vld [vmem:[%s708_s1 + $0x2b0] sm:$0xff] }
  0x25   :  { %176 = vmatpush2.msra.mxu0 %v133_v6  ;;  %247 = vmatpush2.msra.mxu1 %v135_v7  ;;  %v94_v44 = vld [vmem:[%s708_s1 + $0x288] sm:$0xff]  ;;  %v96_v45 = vld [vmem:[%s708_s1 + $0x298] sm:$0xff]  ;;  %v93_v46 = vld [vmem:[%s708_s1 + $0x280] sm:$0xff] }
  0x26   :  { %177 = vmatprep.subr.mxu0 %v130_v8  ;;  %248 = vmatprep.subr.mxu1 %v132_v9  ;;  %v95_v47 = vld [vmem:[%s708_s1 + $0x290] sm:$0xff]  ;;  %v90_v48 = vld [vmem:[%s708_s1 + $0x268] sm:$0xff]  ;;  %v92_v49 = vld [vmem:[%s708_s1 + $0x278] sm:$0xff] }
  0x27   :  { %178 = vmatpush2.msra.mxu0 %v129_v10  ;;  %249 = vmatpush2.msra.mxu1 %v131_v11  ;;  %v89_v50 = vld [vmem:[%s708_s1 + $0x260] sm:$0xff]  ;;  %v91_v51 = vld [vmem:[%s708_s1 + $0x270] sm:$0xff]  ;;  %v86_v52 = vld [vmem:[%s708_s1 + $0x248] sm:$0xff] }
  0x28   :  { %179 = vmatprep.subr.mxu0 %v126_v12  ;;  %250 = vmatprep.subr.mxu1 %v128_v13  ;;  %v88_v53 = vld [vmem:[%s708_s1 + $0x258] sm:$0xff]  ;;  %v85_v54 = vld [vmem:[%s708_s1 + $0x240] sm:$0xff]  ;;  %v87_v55 = vld [vmem:[%s708_s1 + $0x250] sm:$0xff] }
  0x29   :  { %180 = vmatpush2.msra.mxu0 %v125_v14  ;;  %251 = vmatpush2.msra.mxu1 %v127_v15  ;;  %v82_v56 = vld [vmem:[%s708_s1 + $0x228] sm:$0xff]  ;;  %v84_v57 = vld [vmem:[%s708_s1 + $0x238] sm:$0xff]  ;;  %v81_v58 = vld [vmem:[%s708_s1 + $0x220] sm:$0xff] }
  0x2a   :  { %181 = vmatprep.subr.mxu0 %v122_v16  ;;  %252 = vmatprep.subr.mxu1 %v124_v17  ;;  %v83_v59 = vld [vmem:[%s708_s1 + $0x230] sm:$0xff]  ;;  %v78_v60 = vld [vmem:[%s708_s1 + $0x208] sm:$0xff]  ;;  %v80_v61 = vld [vmem:[%s708_s1 + $0x218] sm:$0xff] }
  0x2b   :  { %182 = vmatpush2.msra.mxu0 %v121_v18  ;;  %253 = vmatpush2.msra.mxu1 %v123_v19  ;;  %v77_v62 = vld [vmem:[%s708_s1 + $0x200] sm:$0xff]  ;;  %v12_v63 = vld [vmem:[%s709_s0 + $0x8] sm:$0xff]  ;;  %v79_v0 = vld [vmem:[%s708_s1 + $0x210] sm:$0xff] }
  0x2c   :  { %183 = vmatprep.subr.mxu0 %v118_v20  ;;  %254 = vmatprep.subr.mxu1 %v120_v21  ;;  %v11_v1 = vld [vmem:[%s709_s0] sm:$0xff] }
  0x2d   :  { %184 = vmatpush2.msra.mxu0 %v117_v22  ;;  %255 = vmatpush2.msra.mxu1 %v119_v23 }
  0x2e   :  { %185 = vmatprep.subr.mxu0 %v114_v24  ;;  %256 = vmatprep.subr.mxu1 %v116_v25 }
  0x2f   :  { %186 = vmatpush2.msra.mxu0 %v113_v26  ;;  %257 = vmatpush2.msra.mxu1 %v115_v27 }
  0x30   :  { %187 = vmatprep.subr.mxu0 %v110_v28  ;;  %258 = vmatprep.subr.mxu1 %v112_v29 }
  0x31   :  { %188 = vmatpush2.msra.mxu0 %v109_v30  ;;  %259 = vmatpush2.msra.mxu1 %v111_v31 }
  0x32   :  { %189 = vmatprep.subr.mxu0 %v106_v32  ;;  %260 = vmatprep.subr.mxu1 %v108_v33 }
  0x33   :  { %190 = vmatpush2.msra.mxu0 %v105_v34  ;;  %261 = vmatpush2.msra.mxu1 %v107_v35 }
  0x34   :  { %191 = vmatprep.subr.mxu0 %v102_v36  ;;  %262 = vmatprep.subr.mxu1 %v104_v37 }
  0x35   :  { %192 = vmatpush2.msra.mxu0 %v101_v38  ;;  %263 = vmatpush2.msra.mxu1 %v103_v39 }
  0x36   :  { %193 = vmatprep.subr.mxu0 %v98_v40  ;;  %264 = vmatprep.subr.mxu1 %v100_v41 }
  0x37   :  { %194 = vmatpush2.msra.mxu0 %v97_v42  ;;  %265 = vmatpush2.msra.mxu1 %v99_v43 }
  0x38   :  { %195 = vmatprep.subr.mxu0 %v94_v44  ;;  %266 = vmatprep.subr.mxu1 %v96_v45 }
  0x39   :  { %196 = vmatpush2.msra.mxu0 %v93_v46  ;;  %267 = vmatpush2.msra.mxu1 %v95_v47 }
  0x3a   :  { %197 = vmatprep.subr.mxu0 %v90_v48  ;;  %268 = vmatprep.subr.mxu1 %v92_v49 }
  0x3b   :  { %198 = vmatpush2.msra.mxu0 %v89_v50  ;;  %269 = vmatpush2.msra.mxu1 %v91_v51 }
  0x3c   :  { %199 = vmatprep.subr.mxu0 %v86_v52  ;;  %270 = vmatprep.subr.mxu1 %v88_v53 }
  0x3d   :  { %200 = vmatpush2.msra.mxu0 %v85_v54  ;;  %271 = vmatpush2.msra.mxu1 %v87_v55 }
  0x3e   :  { %201 = vmatprep.subr.mxu0 %v82_v56  ;;  %272 = vmatprep.subr.mxu1 %v84_v57 }
  0x3f   :  { %202 = vmatpush2.msra.mxu0 %v81_v58  ;;  %273 = vmatpush2.msra.mxu1 %v83_v59 }
  0x40   :  { %203 = vmatprep.subr.mxu0 %v78_v60  ;;  %274 = vmatprep.subr.mxu1 %v80_v61 }
  0x41   :  { %204 = vmatpush2.msra.mxu0 %v77_v62  ;;  %205 = vmatprep.mubr.f32.mxu0 %v12_v63 }
  0x42   :  { %275 = vmatpush2.msra.mxu1 %v79_v0  ;;  %276 = vmatprep.mubr.f32.mxu1 %v12_v63 }
  0x43   :  { %206 = vmatmul.mubr.f32.vlgmr.msra.gmra.mxu0 %v11_v1  ;;  %277 = vmatmul.mubr.f32.vlgmr.msra.gmra.mxu1 %v11_v1 }
 0x103   :  { %v207_v2 = vpop.f32.mrf.mxu0  ;;  %v278_v3 = vpop.f32.mrf.mxu1 }
 0x104   :  { %283 = vst [vmem:[%s710_s2] sm:$0xff] %v207_v2  ;;  %285 = vst [vmem:[%s710_s2 + $0x10] sm:$0xff] %v278_v3 }
 0x105   :  { %v209_v4 = vpop.f32.mrf.mxu0  ;;  %v280_v5 = vpop.f32.mrf.mxu1 }
 0x106   :  { %284 = vst [vmem:[%s710_s2 + $0x8] sm:$0xff] %v209_v4  ;;  %286 = vst [vmem:[%s710_s2 + $0x18] sm:$0xff] %v280_v5 }

</bundles_post_ra>
